<compile_context>
chip_gen: v7x
topology: tpu7x:2x2x1
jax: 0.10.0
libtpu: 0.0.40
codegen_flags: <defaults>
</compile_context>

<pallas_src>
import functools
import math

import jax
import jax.numpy as jnp
from jax.experimental import pallas as pl
from jax.experimental.pallas import tpu as pltpu

_LANE_DIM = 512            # lane-dense last dim (multiple of 128)
_TARGET_BLOCK_ROWS = 1024  # ~2 MiB f32 block at lane=512
_ACC_ROWS = 8              # small fixed accumulator height (one sublane group)


def _num_tensorcores() -> int:
    """2 for multi-TensorCore chips (v7x); 1 for v5e/v6e and unknown."""
    try:
        kind = (jax.devices()[0].device_kind or "").lower()
    except Exception:  # pragma: no cover - defensive
        return 1
    return 2 if ("v7" in kind or "tpu7" in kind) else 1


def _iou_partial_kernel(yt_ref, yp_ref, out_ref, acc_i, acc_s, *,
                        rows, tile_r, acc_r, blocks_per_part, needs_mask):
    i = pl.program_id(1)  # reduction ("arbitrary") axis

    @pl.when(i == 0)
    def _init():
        acc_i[...] = jnp.zeros_like(acc_i)
        acc_s[...] = jnp.zeros_like(acc_s)

    def accumulate(yt, yp):
        prod = yt * yp
        ssum = yt + yp
        if tile_r > acc_r:
            # Fold the (tile_r, lane) tile into (acc_r, lane): splitting the
            # row dim at multiples of 8 keeps the (8,128) vreg tiling intact,
            # so this lowers to plain vector adds (no XLU, tiny vst traffic).
            groups = tile_r // acc_r
            prod = jnp.sum(prod.reshape(groups, acc_r, prod.shape[-1]), axis=0)
            ssum = jnp.sum(ssum.reshape(groups, acc_r, ssum.shape[-1]), axis=0)
        acc_i[...] += prod
        acc_s[...] += ssum

    if needs_mask:
        blk = pl.program_id(0) * blocks_per_part + i
        is_edge = (blk + 1) * tile_r > rows  # partial last block or overflow

        @pl.when(jnp.logical_not(is_edge))
        def _clean():
            accumulate(yt_ref[...].astype(jnp.float32),
                       yp_ref[...].astype(jnp.float32))

        @pl.when(is_edge)
        def _edge():
            yt = yt_ref[...].astype(jnp.float32)
            yp = yp_ref[...].astype(jnp.float32)
            # Rows past the real extent (or whole overflow blocks) are zeroed
            # with a select BEFORE the product so garbage/NaNs cannot leak.
            row_ids = (jax.lax.broadcasted_iota(jnp.int32, yt.shape, 0)
                       + blk * tile_r)
            valid = row_ids < rows
            accumulate(jnp.where(valid, yt, 0.0), jnp.where(valid, yp, 0.0))
    else:
        accumulate(yt_ref[...].astype(jnp.float32),
                   yp_ref[...].astype(jnp.float32))

    @pl.when(i == pl.num_programs(1) - 1)
    def _finalize():
        out_ref[0, 0] = jnp.sum(acc_i[...])   # partial intersection
        out_ref[0, 1] = jnp.sum(acc_s[...])   # partial sum(y_true + y_pred)


def iou_loss(y_pred: jax.Array, y_true: jax.Array, smooth: float = 0.001) -> jax.Array:
    """Pallas equivalent of IoULoss.forward(y_pred, y_true) -> scalar loss."""
    assert y_pred.shape == y_true.shape
    total = math.prod(y_pred.shape)

    yp_flat = y_pred.reshape(-1)
    yt_flat = y_true.reshape(-1)

    lane = _LANE_DIM
    rows = total // lane
    tail = total - rows * lane

    if rows == 0:
        # Input smaller than one lane-dense row: just do it in plain JAX.
        inter = jnp.sum(yt_flat.astype(jnp.float32) * yp_flat.astype(jnp.float32))
        tot = jnp.sum(yt_flat.astype(jnp.float32) + yp_flat.astype(jnp.float32))
        union = tot - inter
        return 1.0 - (inter + smooth) / (union + smooth)

    # Lane-aligned prefix: free slice + reshape of the contiguous arrays
    # (no HBM copy, unlike the old jnp.pad).
    yp2 = yp_flat[: rows * lane].reshape(rows, lane)
    yt2 = yt_flat[: rows * lane].reshape(rows, lane)

    # Row tile: ~2 MiB blocks, multiple of 8 sublanes, never bigger than array.
    if rows >= _TARGET_BLOCK_ROWS:
        tile_r = _TARGET_BLOCK_ROWS
    elif rows >= 8:
        tile_r = (rows // 8) * 8
    else:
        tile_r = rows
    n_blocks = -(-rows // tile_r)
    acc_r = _ACC_ROWS if tile_r % _ACC_ROWS == 0 else tile_r

    # 2-way "parallel" split only where a second TensorCore exists (v7x).
    num_parts = 2 if (_num_tensorcores() >= 2 and n_blocks >= 2) else 1
    blocks_per_part = -(-n_blocks // num_parts)
    has_overflow = num_parts * blocks_per_part != n_blocks
    needs_mask = (rows % tile_r != 0) or has_overflow

    def in_map(p, i):
        blk = p * blocks_per_part + i
        if has_overflow:
            # Clamp so overflow blocks (fully zeroed in-kernel) stay in range.
            blk = jnp.minimum(blk, n_blocks - 1)
        return (blk, 0)

    kernel = functools.partial(
        _iou_partial_kernel,
        rows=rows,
        tile_r=tile_r,
        acc_r=acc_r,
        blocks_per_part=blocks_per_part,
        needs_mask=needs_mask,
    )

    partials = pl.pallas_call(
        kernel,
        out_shape=jax.ShapeDtypeStruct((num_parts, 2), jnp.float32),
        grid_spec=pltpu.PrefetchScalarGridSpec(
            num_scalar_prefetch=0,
            grid=(num_parts, blocks_per_part),
            in_specs=[
                pl.BlockSpec((tile_r, lane), in_map),  # y_true tile
                pl.BlockSpec((tile_r, lane), in_map),  # y_pred tile
            ],
            out_specs=pl.BlockSpec((1, 2), lambda p, i: (p, 0),
                                   memory_space=pltpu.SMEM),
            scratch_shapes=[
                pltpu.VMEM((acc_r, lane), jnp.float32),  # intersection acc
                pltpu.VMEM((acc_r, lane), jnp.float32),  # sum acc
            ],
        ),
        compiler_params=pltpu.CompilerParams(
            dimension_semantics=("parallel", "arbitrary"),
            vmem_limit_bytes=32 * 1024 * 1024,
        ),
    )(yt2, yp2)

    intersection = jnp.sum(partials[:, 0])
    total_sum = jnp.sum(partials[:, 1])

    if tail:
        # <512-element flat tail: negligible plain-JAX epilogue (no padding copy).
        yt_t = yt_flat[rows * lane:].astype(jnp.float32)
        yp_t = yp_flat[rows * lane:].astype(jnp.float32)
        intersection = intersection + jnp.sum(yt_t * yp_t)
        total_sum = total_sum + jnp.sum(yt_t + yp_t)

    union = total_sum - intersection
    return 1.0 - (intersection + smooth) / (union + smooth)


def _iou_loss_ref(y_pred, y_true, smooth=0.001):
    inter = jnp.sum(y_true * y_pred)
    union = jnp.sum(y_true + y_pred) - inter
    return 1.0 - (inter + smooth) / (union + smooth)


if __name__ == "__main__":
    key = jax.random.PRNGKey(0)
    k1, k2, k3, k4, k5, k6 = jax.random.split(key, 6)

    # Spec shape: (N, 1, H, W), predictions in [0,1], binary ground truth.
    y_pred = jax.random.uniform(k1, (2, 1, 16, 16), dtype=jnp.float32)
    y_true = (jax.random.uniform(k2, (2, 1, 16, 16)) > 0.5).astype(jnp.float32)
    loss = jax.block_until_ready(iou_loss(y_pred, y_true))
    ref = _iou_loss_ref(y_pred, y_true)
    assert jnp.allclose(loss, ref, atol=1e-5, rtol=1e-5), (loss, ref)

    # Ragged size (1200 elems): exercises the flat-tail epilogue path.
    y_pred2 = jax.random.uniform(k3, (3, 1, 20, 20), dtype=jnp.float32)
    y_true2 = (jax.random.uniform(k4, (3, 1, 20, 20)) > 0.5).astype(jnp.float32)
    loss2 = jax.block_until_ready(iou_loss(y_pred2, y_true2))
    ref2 = _iou_loss_ref(y_pred2, y_true2)
    assert jnp.allclose(loss2, ref2, atol=1e-5, rtol=1e-5), (loss2, ref2)

    # 9216 elems: exercises the partial-edge-block mask and the accumulator fold.
    y_pred3 = jax.random.uniform(k5, (2, 1, 64, 72), dtype=jnp.float32)
    y_true3 = (jax.random.uniform(k6, (2, 1, 64, 72)) > 0.5).astype(jnp.float32)
    loss3 = jax.block_until_ready(iou_loss(y_pred3, y_true3))
    ref3 = _iou_loss_ref(y_pred3, y_true3)
    assert jnp.allclose(loss3, ref3, atol=1e-5, rtol=1e-5), (loss3, ref3)

    print("KERNEL_OK")
</pallas_src>

<mosaic_0001>
module attributes {stable_mosaic.version = 11 : i64} {
  func.func @_iou_partial_kernel(%arg0: i32, %arg1: i32, %arg2: memref<1x512xf32, #tpu.memory_space<vmem>>, %arg3: memref<1x512xf32, #tpu.memory_space<vmem>>, %arg4: memref<1x2xf32, #tpu.memory_space<smem>>, %arg5: memref<1x512xf32, #tpu.memory_space<vmem>>, %arg6: memref<1x512xf32, #tpu.memory_space<vmem>>) attributes {dimension_semantics = [#tpu.dimension_semantics<parallel>, #tpu.dimension_semantics<arbitrary>], iteration_bounds = array<i64: 1, 1>, scalar_prefetch = 0 : i64, scratch_operands = 2 : i64, tpu.core_type = #tpu.core_type<tc>, window_params = [{transform_indices = @transform_0, window_bounds = array<i64: 1, 512>}, {transform_indices = @transform_1, window_bounds = array<i64: 1, 512>}, {transform_indices = @transform_2, window_bounds = array<i64: 1, 2>}]} {
    %c0_i32 = arith.constant 0 : i32
    %0 = arith.cmpi eq, %arg1, %c0_i32 : i32
    %1 = arith.extui %0 : i1 to i32
    %c0_i32_0 = arith.constant 0 : i32
    %2 = arith.cmpi ne, %1, %c0_i32_0 : i32
    scf.if %2 {
      %cst = arith.constant 0.000000e+00 : f32
      %16 = vector.broadcast %cst : f32 to vector<1x512xf32>
      %c0_14 = arith.constant 0 : index
      %c0_15 = arith.constant 0 : index
      %17 = vector.load %arg5[%c0_14, %c0_15] : memref<1x512xf32, #tpu.memory_space<vmem>>, vector<1x512xf32>
      tpu.vector_store %arg5[%c0_14, %c0_15], %16 {strides = array<i32>} : memref<1x512xf32, #tpu.memory_space<vmem>>, vector<1x512xf32>,
      %cst_16 = arith.constant 0.000000e+00 : f32
      %18 = vector.broadcast %cst_16 : f32 to vector<1x512xf32>
      %c0_17 = arith.constant 0 : index
      %c0_18 = arith.constant 0 : index
      %19 = vector.load %arg6[%c0_17, %c0_18] : memref<1x512xf32, #tpu.memory_space<vmem>>, vector<1x512xf32>
      tpu.vector_store %arg6[%c0_17, %c0_18], %18 {strides = array<i32>} : memref<1x512xf32, #tpu.memory_space<vmem>>, vector<1x512xf32>,
    } else {
    }
    %c0 = arith.constant 0 : index
    %c0_1 = arith.constant 0 : index
    %3 = vector.load %arg2[%c0, %c0_1] : memref<1x512xf32, #tpu.memory_space<vmem>>, vector<1x512xf32>
    %c0_2 = arith.constant 0 : index
    %c0_3 = arith.constant 0 : index
    %4 = vector.load %arg3[%c0_2, %c0_3] : memref<1x512xf32, #tpu.memory_space<vmem>>, vector<1x512xf32>
    %5 = arith.mulf %3, %4 : vector<1x512xf32>
    %6 = arith.addf %3, %4 : vector<1x512xf32>
    %c0_4 = arith.constant 0 : index
    %c0_5 = arith.constant 0 : index
    %7 = vector.load %arg5[%c0_4, %c0_5] : memref<1x512xf32, #tpu.memory_space<vmem>>, vector<1x512xf32>
    %8 = arith.addf %7, %5 : vector<1x512xf32>
    %c0_6 = arith.constant 0 : index
    %c0_7 = arith.constant 0 : index
    %9 = vector.load %arg5[%c0_6, %c0_7] : memref<1x512xf32, #tpu.memory_space<vmem>>, vector<1x512xf32>
    tpu.vector_store %arg5[%c0_6, %c0_7], %8 {strides = array<i32>} : memref<1x512xf32, #tpu.memory_space<vmem>>, vector<1x512xf32>,
    %c0_8 = arith.constant 0 : index
    %c0_9 = arith.constant 0 : index
    %10 = vector.load %arg6[%c0_8, %c0_9] : memref<1x512xf32, #tpu.memory_space<vmem>>, vector<1x512xf32>
    %11 = arith.addf %10, %6 : vector<1x512xf32>
    %c0_10 = arith.constant 0 : index
    %c0_11 = arith.constant 0 : index
    %12 = vector.load %arg6[%c0_10, %c0_11] : memref<1x512xf32, #tpu.memory_space<vmem>>, vector<1x512xf32>
    tpu.vector_store %arg6[%c0_10, %c0_11], %11 {strides = array<i32>} : memref<1x512xf32, #tpu.memory_space<vmem>>, vector<1x512xf32>,
    %c0_i32_12 = arith.constant 0 : i32
    %13 = arith.cmpi eq, %arg1, %c0_i32_12 : i32
    %14 = arith.extui %13 : i1 to i32
    %c0_i32_13 = arith.constant 0 : i32
    %15 = arith.cmpi ne, %14, %c0_i32_13 : i32
    scf.if %15 {
      %c0_14 = arith.constant 0 : index
      %c0_15 = arith.constant 0 : index
      %16 = vector.load %arg5[%c0_14, %c0_15] : memref<1x512xf32, #tpu.memory_space<vmem>>, vector<1x512xf32>
      %17 = vector.shape_cast %16 : vector<1x512xf32> to vector<1x1x512xf32>
      %cst = arith.constant dense<0.000000e+00> : vector<1xf32>
      %18 = vector.multi_reduction <add>, %17, %cst [1, 2] : vector<1x1x512xf32> to vector<1xf32>
      %19 = vector.shape_cast %18 : vector<1xf32> to vector<1x1x1xf32>
      %20 = vector.extract %19[0, 0, 0] : f32 from vector<1x1x1xf32>
      %c0_16 = arith.constant 0 : index
      %c0_17 = arith.constant 0 : index
      %21 = memref.load %arg4[%c0_16, %c0_17] : memref<1x2xf32, #tpu.memory_space<smem>>
      memref.store %20, %arg4[%c0_16, %c0_17] : memref<1x2xf32, #tpu.memory_space<smem>>
      %c0_18 = arith.constant 0 : index
      %c0_19 = arith.constant 0 : index
      %22 = vector.load %arg6[%c0_18, %c0_19] : memref<1x512xf32, #tpu.memory_space<vmem>>, vector<1x512xf32>
      %23 = vector.shape_cast %22 : vector<1x512xf32> to vector<1x1x512xf32>
      %cst_20 = arith.constant dense<0.000000e+00> : vector<1xf32>
      %24 = vector.multi_reduction <add>, %23, %cst_20 [1, 2] : vector<1x1x512xf32> to vector<1xf32>
      %25 = vector.shape_cast %24 : vector<1xf32> to vector<1x1x1xf32>
      %26 = vector.extract %25[0, 0, 0] : f32 from vector<1x1x1xf32>
      %c0_21 = arith.constant 0 : index
      %c1 = arith.constant 1 : index
      %27 = memref.load %arg4[%c0_21, %c1] : memref<1x2xf32, #tpu.memory_space<smem>>
      memref.store %26, %arg4[%c0_21, %c1] : memref<1x2xf32, #tpu.memory_space<smem>>
    } else {
    }
    return
  }
  func.func @transform_0(%arg0: i32, %arg1: i32) -> (i32, i32) {
    %c1_i32 = arith.constant 1 : i32
    %0 = arith.muli %arg0, %c1_i32 : i32
    %1 = arith.addi %0, %arg1 : i32
    %c0_i32 = arith.constant 0 : i32
    %c0_i32_0 = arith.constant 0 : i32
    return %1, %c0_i32 : i32, i32
  }
  func.func @transform_1(%arg0: i32, %arg1: i32) -> (i32, i32) {
    %c1_i32 = arith.constant 1 : i32
    %0 = arith.muli %arg0, %c1_i32 : i32
    %1 = arith.addi %0, %arg1 : i32
    %c0_i32 = arith.constant 0 : i32
    %c0_i32_0 = arith.constant 0 : i32
    return %1, %c0_i32 : i32, i32
  }
  func.func @transform_2(%arg0: i32, %arg1: i32) -> (i32, i32) {
    %c0_i32 = arith.constant 0 : i32
    %c0_i32_0 = arith.constant 0 : i32
    return %arg0, %c0_i32 : i32, i32
  }
}

</mosaic_0001>

<bundles_post_ra>
// kernel: tpu_custom_call.1
= control target key start
LH: loop header
LB: loop body
LE: loop exit
PB: predicated region body
PF: predicated region fallthrough
CT: control target
= control target key end

     0   :  { %7 = vsyncpa [#allocation5], 0  ;;  %s300_s0 = inlined_call_operand.hbm [shape: f32[1,512], index: 0, kind: input, shape index: {}]   ;;  %s301_s1 = inlined_call_operand.hbm [shape: f32[1,512], index: 1, kind: input, shape index: {}]   ;;  %s302_s2 = inlined_call_operand.hbm [shape: f32[1,2], index: 2, kind: output, shape index: {}]  }
   0x1   :  { %8 = vsyncpa [#allocation8], 0 }
   0x2   :  { %9 = vsyncpa [#allocation6], 0  ;;  %s237_s9 = smov [#allocation4]   ;;  %s238_s11 = smov [#allocation7]  }
   0x3   :  { %s20_s10 = sshll.u32 %s237_s9, 4  ;;  %s34_s12 = sshll.u32 %s238_s11, 4  ;;  %s21_s10 = int_to_ptr.vmem [resolvable:$true] %s20_s10  ;;  %s35_s12 = int_to_ptr.vmem [resolvable:$true] %s34_s12 }
   0x4   :  { %s177_s15 = scalar_lea.hbm %s300_s0, 64 }
   0x5   :  { %p178_p0 = scmp.ne.s32.totalorder %s300_s0, %s177_s15  ;;  %p181_p1 = scmp.lt.u32.totalorder %s177_s15, %s300_s0 }
   0x7   :  { %p183_p2 = pnand %p181_p1, %p178_p0 }
   0x9   :  { %186 = shalt.err (!%p183_p2)
}
   0xa   :  { %s187_s20 = scalar_lea.vmem %s21_s10, 64  ;;  %p192_p4 = scmp.lt.s32.totalorder %s21_s10, %s21_s10 }
   0xb   :  { %p188_p3 = scmp.ne.s32.totalorder %s21_s10, %s187_s20  ;;  %p193_p5 = scmp.lt.s32.totalorder %s187_s20, %s187_s20 }
   0xd   :  { %p194_p6 = por %p193_p5, %p192_p4 }
   0xf   :  { %p195_p7 = pnand %p194_p6, %p188_p3 }
  0x11   :  { %198 = shalt.err (!%p195_p7)
}
  0x12   :  { %23 = dma.hbm_to_vmem [thread:$0]  %s300_s0, 64, %s21_s10, [#allocation5]  }
  0x13   :  { %s199_s25 = scalar_lea.hbm %s301_s1, 64 }
  0x14   :  { %p200_p8 = scmp.ne.s32.totalorder %s301_s1, %s199_s25  ;;  %p203_p9 = scmp.lt.u32.totalorder %s199_s25, %s301_s1 }
  0x16   :  { %p205_p10 = pnand %p203_p9, %p200_p8 }
  0x18   :  { %208 = shalt.err (!%p205_p10)
}
  0x19   :  { %s209_s30 = scalar_lea.vmem %s35_s12, 64  ;;  %p214_p12 = scmp.lt.s32.totalorder %s35_s12, %s35_s12 }
  0x1a   :  { %p210_p11 = scmp.ne.s32.totalorder %s35_s12, %s209_s30  ;;  %p215_p13 = scmp.lt.s32.totalorder %s209_s30, %s209_s30 }
  0x1c   :  { %p216_p0 = por %p215_p13, %p214_p12 }
  0x1e   :  { %p217_p1 = pnand %p216_p0, %p210_p11 }
  0x20   :  { %220 = shalt.err (!%p217_p1)
}
  0x21   :  { %37 = dma.hbm_to_vmem [thread:$0]  %s301_s1, 64, %s35_s12, [#allocation8]  }
  0x22   :  { %231 = dma.done.wait [#allocation5], 64  }
  0x23   :  { %232 = vsyncadd [#allocation5], 4294967232 }
  0x24   :  { %233 = dma.done.wait [#allocation8], 64  }
  0x25   :  { %234 = vsyncadd [#allocation8], 4294967232  ;;  %v50_v0 = vlaneseq  ;;  %v239_v1 = vmov 0.0   ;;  %v56_v2 = vld [vmem:[#allocation4] sm:$0xf]  ;;  %vm95_vm1 = vcmask 1040384  }
  0x26   :  { %v57_v3 = vld [vmem:[#allocation7] sm:$0xf]  ;;  %s221_s7 = scalar_lea.hbm %s302_s2, 16 }
  0x27   :  { %vm52_vm0 = vcmp.lt.s32.totalorder %v50_v0, 512  ;;  %v58_v4 = vmul.f32 %v57_v3, %v56_v2  ;;  %v59_v5 = vadd.f32 %v57_v3, %v56_v2  ;;  %v76_v10 = vshrl.u32 %v50_v0, 7  ;;  %p222_p2 = scmp.ne.s32.totalorder %s302_s2, %s221_s7  ;;  %p225_p3 = scmp.lt.u32.totalorder %s221_s7, %s302_s2 }
  0x28   :  { %54 = vst.msk [vmem:[#allocation2] sm:$0xf] %vm52_vm0, %v239_v1  ;;  %55 = vst.msk [vmem:[#allocation3] sm:$0xf] %vm52_vm0, %v239_v1 }
  0x29   :  { %v77_v11 = vsub.s32 0, %v76_v10  ;;  %v81_v12 = vsub.s32 1, %v76_v10  ;;  %v85_v13 = vsub.s32 2, %v76_v10  ;;  %v89_v14 = vsub.s32 3, %v76_v10  ;;  %p227_p4 = pnand %p225_p3, %p222_p2 }
  0x2f   :  { %v60_v6 = vld [vmem:[#allocation2] sm:$0xf]  ;;  %v67_v7 = vld [vmem:[#allocation3] sm:$0xf] }
  0x30   :  { %v61_v8 = vadd.f32 %v60_v6, %v58_v4  ;;  %v68_v9 = vadd.f32 %v67_v7, %v59_v5 }
  0x32   :  { %66 = vst.msk [vmem:[#allocation2] sm:$0xf] %vm52_vm0, %v61_v8  ;;  %69 = vst.msk [vmem:[#allocation3] sm:$0xf] %vm52_vm0, %v68_v9 }
  0x39   :  { %v73_v15 = vld [vmem:[#allocation2] sm:$0xf]  ;;  %v114_v16 = vld [vmem:[#allocation3] sm:$0xf] }
  0x3a   :  { %v78_v17 = vrot.slane %v73_v15, %v77_v11  ;;  %v82_v18 = vrot.slane %v73_v15, %v81_v12  ;;  %v86_v19 = vrot.slane %v73_v15, %v85_v13  ;;  %v90_v20 = vrot.slane %v73_v15, %v89_v14 }
  0x3b   :  { %v119_v21 = vrot.slane %v114_v16, %v77_v11  ;;  %v123_v22 = vrot.slane %v114_v16, %v81_v12  ;;  %v127_v23 = vrot.slane %v114_v16, %v85_v13  ;;  %v131_v27 = vrot.slane %v114_v16, %v89_v14 }
  0x3c   :  { %v96_v24 = vsel %vm95_vm1, %v78_v17, 0.0  ;;  %v97_v25 = vsel %vm95_vm1, %v82_v18, 0.0  ;;  %v99_v26 = vsel %vm95_vm1, %v86_v19, 0.0  ;;  %v101_v32 = vsel %vm95_vm1, %v90_v20, 0.0 }
  0x3d   :  { %v98_v28 = vadd.f32 %v97_v25, %v96_v24  ;;  %v136_v29 = vsel %vm95_vm1, %v119_v21, 0.0  ;;  %v137_v30 = vsel %vm95_vm1, %v123_v22, 0.0  ;;  %v139_v31 = vsel %vm95_vm1, %v127_v23, 0.0 }
  0x3e   :  { %v138_v33 = vadd.f32 %v137_v30, %v136_v29  ;;  %v141_v36 = vsel %vm95_vm1, %v131_v27, 0.0 }
  0x3f   :  { %v100_v34 = vadd.f32 %v99_v26, %v98_v28 }
  0x40   :  { %v140_v35 = vadd.f32 %v139_v31, %v138_v33 }
  0x41   :  { %v102_v37 = vadd.f32 %v101_v32, %v100_v34 }
  0x42   :  { %v142_v38 = vadd.f32 %v141_v36, %v140_v35 }
  0x43   :  { %103 = vadd.xlane.f32.xlu0 %v102_v37 }
  0x47   :  { %143 = vadd.xlane.f32.xlu0 %v142_v38 }
  0xd0   :  { %v104_v39 = vpop.xlane.xlu0 %103 }
  0xd1   :  { %v105_v40 = vrot.slane %v104_v39, 4 }
  0xd3   :  { %v106_v41 = vadd.f32 %v105_v40, %v104_v39 }
  0xd4   :  { %v144_v42 = vpop.xlane.xlu0 %143 }
  0xd5   :  { %v107_v43 = vrot.slane %v106_v41, 2  ;;  %v145_v44 = vrot.slane %v144_v42, 4 }
  0xd7   :  { %v146_v45 = vadd.f32 %v145_v44, %v144_v42  ;;  %v108_v46 = vadd.f32 %v107_v43, %v106_v41 }
  0xd9   :  { %v147_v47 = vrot.slane %v146_v45, 2  ;;  %v109_v48 = vrot.slane %v108_v46, 1 }
  0xdb   :  { %v148_v49 = vadd.f32 %v147_v47, %v146_v45  ;;  %v110_v50 = vadd.f32 %v109_v48, %v108_v46 }
  0xdd   :  { %169 = vpush %v110_v50  ;;  %v149_v51 = vrot.slane %v148_v49, 1 }
  0xdf   :  { %v150_v52 = vadd.f32 %v149_v51, %v148_v49 }
  0xe1   :  { %171 = vpush %v150_v52 }
 0x10e   :  { %s170_s1 = spop %169 }
 0x10f   :  { %113 = sst [smem:[#allocation9]] %s170_s1 }
 0x112   :  { %s172_s4 = spop %171 }
 0x113   :  { %153 = sst [smem:[#allocation9 + $0x1]] %s172_s4 }
 0x114   :  { %230 = shalt.err (!%p227_p4)
}
 0x115   :  { %s240_s12 = smov [#allocation9]  }
 0x116   :  { %161 = dma.smem_to_hbm %s240_s12, 16, %s302_s2, [#allocation6]  }
 0x117   :  { %235 = dma.done.wait [#allocation6], 16  }
 0x118   :  { %236 = vsyncadd [#allocation6], 4294967280 }
 0x119   :  { %165 = sfence }
 0x11a   :  { %166 = vsyncpa [#allocation5], 1 }
 0x11b   :  { %167 = vsyncpa [#allocation8], 1 }
 0x11c   :  { %168 = vsyncpa [#allocation6], 1 }

</bundles_post_ra>
